<compile_context>
chip_gen: v7x
topology: tpu7x:2x2x1
jax: 0.10.0
libtpu: 0.0.40
codegen_flags: <defaults>
</compile_context>

<pallas_src>
import jax
import jax.numpy as jnp
from jax.experimental import pallas as pl
from jax.experimental.pallas import tpu as pltpu

HIDDEN = 128
MAX_TILE_B = 512  # (512, 128) f32 activations + bf16 weights fit comfortably in VMEM


def _round_up(n, m):
    return ((n + m - 1) // m) * m


def _mlp_kernel(x_ref, w1_ref, b1_ref, w2_ref, b2_ref, w3_ref, b3_ref, o_ref):
    # x_ref: (TILE_B, n_obs) f32; w*: (in, out) bf16; b*: (1, out) f32; o_ref: (TILE_B, n_pad) f32
    x = x_ref[...].astype(jnp.bfloat16)
    h1 = jnp.dot(x, w1_ref[...], preferred_element_type=jnp.float32) + b1_ref[...]
    h1 = jnp.maximum(h1, 0.0).astype(jnp.bfloat16)
    h2 = jnp.dot(h1, w2_ref[...], preferred_element_type=jnp.float32) + b2_ref[...]
    h2 = jnp.maximum(h2, 0.0).astype(jnp.bfloat16)
    o_ref[...] = jnp.dot(h2, w3_ref[...], preferred_element_type=jnp.float32) + b3_ref[...]


@jax.jit
def dqn_network_forward(x, params):
    """Forward pass of the DQN `network` module.

    x: [batch, n_observations] float32
    params: W1 (n_obs,128), b1 (128,), W2 (128,128), b2 (128,),
            W3 (128, n_actions), b3 (n_actions,)  -- weights stored (in, out).
    Returns [batch, n_actions] float32 Q-values.
    """
    batch, n_obs = x.shape
    n_actions = params["W3"].shape[1]
    n_pad = max(HIDDEN, _round_up(n_actions, 128))  # lane-dense output width

    # bf16 weights for the MXU; f32 biases broadcast as (1, out).
    w1 = params["W1"].astype(jnp.bfloat16)
    w2 = params["W2"].astype(jnp.bfloat16)
    w3 = jnp.pad(params["W3"], ((0, 0), (0, n_pad - n_actions))).astype(jnp.bfloat16)
    b1 = params["b1"].reshape(1, -1).astype(jnp.float32)
    b2 = params["b2"].reshape(1, -1).astype(jnp.float32)
    b3 = jnp.pad(params["b3"], (0, n_pad - n_actions)).reshape(1, -1).astype(jnp.float32)

    # Batch tiling: small batches get a single (8-aligned) tile, big batches 512-row tiles.
    tile_b = min(MAX_TILE_B, _round_up(batch, 8))
    padded_batch = _round_up(batch, tile_b)
    if padded_batch != batch:
        x = jnp.pad(x, ((0, padded_batch - batch), (0, 0)))
    x = x.astype(jnp.float32)
    n_steps = padded_batch // tile_b

    def const(shape):
        return pl.BlockSpec(shape, lambda i: (0,) * len(shape))

    flops = 2 * padded_batch * (n_obs * HIDDEN + HIDDEN * HIDDEN + HIDDEN * n_pad)
    bytes_accessed = (
        x.size * 4
        + (w1.size + w2.size + w3.size) * 2
        + (b1.size + b2.size + b3.size) * 4
        + padded_batch * n_pad * 4
    )

    out = pl.pallas_call(
        _mlp_kernel,
        out_shape=jax.ShapeDtypeStruct((padded_batch, n_pad), jnp.float32),
        grid=(n_steps,),
        in_specs=[
            pl.BlockSpec((tile_b, n_obs), lambda i: (i, 0)),  # x tile, pipelined over batch
            const(w1.shape),
            const(b1.shape),
            const(w2.shape),
            const(b2.shape),
            const(w3.shape),
            const(b3.shape),
        ],
        out_specs=pl.BlockSpec((tile_b, n_pad), lambda i: (i, 0)),
        compiler_params=pltpu.CompilerParams(
            dimension_semantics=("parallel",),  # megacore sharding on v7x
        ),
        cost_estimate=pl.CostEstimate(
            flops=flops, transcendentals=0, bytes_accessed=bytes_accessed
        ),
    )(x, w1, b1, w2, b2, w3, b3)

    return out[:batch, :n_actions]


def init_params(key, n_observations, n_actions, hidden=HIDDEN):
    """Deterministic init mirroring nn.Linear default (uniform +/- 1/sqrt(fan_in)).

    Weights stored transposed relative to PyTorch: shape (in, out).
    """
    ks = jax.random.split(key, 6)

    def linear(kw, kb, fan_in, fan_out):
        bound = 1.0 / jnp.sqrt(jnp.float32(fan_in))
        w = jax.random.uniform(kw, (fan_in, fan_out), jnp.float32, -bound, bound)
        b = jax.random.uniform(kb, (fan_out,), jnp.float32, -bound, bound)
        return w, b

    w1, b1 = linear(ks[0], ks[1], n_observations, hidden)
    w2, b2 = linear(ks[2], ks[3], hidden, hidden)
    w3, b3 = linear(ks[4], ks[5], hidden, n_actions)
    return {"W1": w1, "b1": b1, "W2": w2, "b2": b2, "W3": w3, "b3": b3}


def reference_forward(x, params):
    """Pure-JAX reference matching the kernel's bf16-matmul / f32-accumulate math."""
    w1 = params["W1"].astype(jnp.bfloat16)
    w2 = params["W2"].astype(jnp.bfloat16)
    w3 = params["W3"].astype(jnp.bfloat16)
    h1 = jnp.dot(x.astype(jnp.bfloat16), w1, preferred_element_type=jnp.float32) + params["b1"]
    h1 = jnp.maximum(h1, 0.0).astype(jnp.bfloat16)
    h2 = jnp.dot(h1, w2, preferred_element_type=jnp.float32) + params["b2"]
    h2 = jnp.maximum(h2, 0.0).astype(jnp.bfloat16)
    return jnp.dot(h2, w3, preferred_element_type=jnp.float32) + params["b3"]


if __name__ == "__main__":
    key = jax.random.PRNGKey(0)
    k_params, k_x = jax.random.split(key)

    n_observations = 4   # e.g. CartPole state dim
    n_actions = 2
    batch = 8

    params = init_params(k_params, n_observations, n_actions)
    x = jax.random.normal(k_x, (batch, n_observations), jnp.float32)

    out = dqn_network_forward(x, params)
    out = jax.block_until_ready(out)

    ref = reference_forward(x, params)
    assert out.shape == (batch, n_actions), out.shape
    assert jnp.allclose(out, ref, atol=2e-2, rtol=2e-2), jnp.max(jnp.abs(out - ref))

    print("KERNEL_OK")
</pallas_src>

<mosaic_0001>
module attributes {stable_mosaic.version = 11 : i64} {
  func.func @_mlp_kernel(%arg0: i32, %arg1: memref<8x4xf32, #tpu.memory_space<vmem>>, %arg2: memref<4x128xbf16, #tpu.memory_space<vmem>>, %arg3: memref<1x128xf32, #tpu.memory_space<vmem>>, %arg4: memref<128x128xbf16, #tpu.memory_space<vmem>>, %arg5: memref<1x128xf32, #tpu.memory_space<vmem>>, %arg6: memref<128x128xbf16, #tpu.memory_space<vmem>>, %arg7: memref<1x128xf32, #tpu.memory_space<vmem>>, %arg8: memref<8x128xf32, #tpu.memory_space<vmem>>) attributes {dimension_semantics = [#tpu.dimension_semantics<parallel>], iteration_bounds = array<i64: 1>, scalar_prefetch = 0 : i64, scratch_operands = 0 : i64, tpu.core_type = #tpu.core_type<tc>, window_params = [{transform_indices = @transform_0, window_bounds = array<i64: 8, 4>}, {pipeline_mode = #tpu.pipeline_mode<synchronous>, transform_indices = @transform_1, window_bounds = array<i64: 4, 128>}, {pipeline_mode = #tpu.pipeline_mode<synchronous>, transform_indices = @transform_2, window_bounds = array<i64: 1, 128>}, {pipeline_mode = #tpu.pipeline_mode<synchronous>, transform_indices = @transform_3, window_bounds = array<i64: 128, 128>}, {pipeline_mode = #tpu.pipeline_mode<synchronous>, transform_indices = @transform_4, window_bounds = array<i64: 1, 128>}, {pipeline_mode = #tpu.pipeline_mode<synchronous>, transform_indices = @transform_5, window_bounds = array<i64: 128, 128>}, {pipeline_mode = #tpu.pipeline_mode<synchronous>, transform_indices = @transform_6, window_bounds = array<i64: 1, 128>}, {transform_indices = @transform_7, window_bounds = array<i64: 8, 128>}]} {
    %c0 = arith.constant 0 : index
    %c0_0 = arith.constant 0 : index
    %0 = vector.load %arg1[%c0, %c0_0] : memref<8x4xf32, #tpu.memory_space<vmem>>, vector<8x4xf32>
    %1 = arith.truncf %0 : vector<8x4xf32> to vector<8x4xbf16>
    %c0_1 = arith.constant 0 : index
    %c0_2 = arith.constant 0 : index
    %2 = vector.load %arg2[%c0_1, %c0_2] : memref<4x128xbf16, #tpu.memory_space<vmem>>, vector<4x128xbf16>
    %cst = arith.constant dense<0.000000e+00> : vector<8x128xf32>
    %3 = tpu.matmul %1, %2, %cst {dimension_numbers = #tpu.dot_dimension_numbers<[1], [0], [0], [1], [0, 0, 1, 1], [], []>} : vector<8x4xbf16>, vector<4x128xbf16>, vector<8x128xf32> -> vector<8x128xf32>
    %c0_3 = arith.constant 0 : index
    %c0_4 = arith.constant 0 : index
    %4 = vector.load %arg3[%c0_3, %c0_4] : memref<1x128xf32, #tpu.memory_space<vmem>>, vector<1x128xf32>
    %5 = vector.broadcast %4 : vector<1x128xf32> to vector<8x128xf32>
    %6 = arith.addf %3, %5 : vector<8x128xf32>
    %cst_5 = arith.constant 0.000000e+00 : f32
    %7 = vector.broadcast %cst_5 : f32 to vector<8x128xf32>
    %8 = arith.maximumf %6, %7 : vector<8x128xf32>
    %9 = arith.truncf %8 : vector<8x128xf32> to vector<8x128xbf16>
    %c0_6 = arith.constant 0 : index
    %c0_7 = arith.constant 0 : index
    %10 = vector.load %arg4[%c0_6, %c0_7] : memref<128x128xbf16, #tpu.memory_space<vmem>>, vector<128x128xbf16>
    %cst_8 = arith.constant dense<0.000000e+00> : vector<8x128xf32>
    %11 = tpu.matmul %9, %10, %cst_8 {dimension_numbers = #tpu.dot_dimension_numbers<[1], [0], [0], [1], [0, 0, 1, 1], [], []>} : vector<8x128xbf16>, vector<128x128xbf16>, vector<8x128xf32> -> vector<8x128xf32>
    %c0_9 = arith.constant 0 : index
    %c0_10 = arith.constant 0 : index
    %12 = vector.load %arg5[%c0_9, %c0_10] : memref<1x128xf32, #tpu.memory_space<vmem>>, vector<1x128xf32>
    %13 = vector.broadcast %12 : vector<1x128xf32> to vector<8x128xf32>
    %14 = arith.addf %11, %13 : vector<8x128xf32>
    %cst_11 = arith.constant 0.000000e+00 : f32
    %15 = vector.broadcast %cst_11 : f32 to vector<8x128xf32>
    %16 = arith.maximumf %14, %15 : vector<8x128xf32>
    %17 = arith.truncf %16 : vector<8x128xf32> to vector<8x128xbf16>
    %c0_12 = arith.constant 0 : index
    %c0_13 = arith.constant 0 : index
    %18 = vector.load %arg6[%c0_12, %c0_13] : memref<128x128xbf16, #tpu.memory_space<vmem>>, vector<128x128xbf16>
    %cst_14 = arith.constant dense<0.000000e+00> : vector<8x128xf32>
    %19 = tpu.matmul %17, %18, %cst_14 {dimension_numbers = #tpu.dot_dimension_numbers<[1], [0], [0], [1], [0, 0, 1, 1], [], []>} : vector<8x128xbf16>, vector<128x128xbf16>, vector<8x128xf32> -> vector<8x128xf32>
    %c0_15 = arith.constant 0 : index
    %c0_16 = arith.constant 0 : index
    %20 = vector.load %arg7[%c0_15, %c0_16] : memref<1x128xf32, #tpu.memory_space<vmem>>, vector<1x128xf32>
    %21 = vector.broadcast %20 : vector<1x128xf32> to vector<8x128xf32>
    %22 = arith.addf %19, %21 : vector<8x128xf32>
    %c0_17 = arith.constant 0 : index
    %c0_18 = arith.constant 0 : index
    %23 = vector.load %arg8[%c0_17, %c0_18] : memref<8x128xf32, #tpu.memory_space<vmem>>, vector<8x128xf32>
    tpu.vector_store %arg8[%c0_17, %c0_18], %22 {strides = array<i32>} : memref<8x128xf32, #tpu.memory_space<vmem>>, vector<8x128xf32>,
    return
  }
  func.func @transform_0(%arg0: i32) -> (i32, i32) {
    %c0_i32 = arith.constant 0 : i32
    %c0_i32_0 = arith.constant 0 : i32
    return %arg0, %c0_i32 : i32, i32
  }
  func.func @transform_1(%arg0: i32) -> (i32, i32) {
    %c0_i32 = arith.constant 0 : i32
    %c0_i32_0 = arith.constant 0 : i32
    %c0_i32_1 = arith.constant 0 : i32
    return %c0_i32, %c0_i32_0 : i32, i32
  }
  func.func @transform_2(%arg0: i32) -> (i32, i32) {
    %c0_i32 = arith.constant 0 : i32
    %c0_i32_0 = arith.constant 0 : i32
    %c0_i32_1 = arith.constant 0 : i32
    return %c0_i32, %c0_i32_0 : i32, i32
  }
  func.func @transform_3(%arg0: i32) -> (i32, i32) {
    %c0_i32 = arith.constant 0 : i32
    %c0_i32_0 = arith.constant 0 : i32
    %c0_i32_1 = arith.constant 0 : i32
    return %c0_i32, %c0_i32_0 : i32, i32
  }
  func.func @transform_4(%arg0: i32) -> (i32, i32) {
    %c0_i32 = arith.constant 0 : i32
    %c0_i32_0 = arith.constant 0 : i32
    %c0_i32_1 = arith.constant 0 : i32
    return %c0_i32, %c0_i32_0 : i32, i32
  }
  func.func @transform_5(%arg0: i32) -> (i32, i32) {
    %c0_i32 = arith.constant 0 : i32
    %c0_i32_0 = arith.constant 0 : i32
    %c0_i32_1 = arith.constant 0 : i32
    return %c0_i32, %c0_i32_0 : i32, i32
  }
  func.func @transform_6(%arg0: i32) -> (i32, i32) {
    %c0_i32 = arith.constant 0 : i32
    %c0_i32_0 = arith.constant 0 : i32
    %c0_i32_1 = arith.constant 0 : i32
    return %c0_i32, %c0_i32_0 : i32, i32
  }
  func.func @transform_7(%arg0: i32) -> (i32, i32) {
    %c0_i32 = arith.constant 0 : i32
    %c0_i32_0 = arith.constant 0 : i32
    return %arg0, %c0_i32 : i32, i32
  }
}

</mosaic_0001>

<bundles_post_ra>
// kernel: dqn_network_forward.1
= control target key start
LH: loop header
LB: loop body
LE: loop exit
PB: predicated region body
PF: predicated region fallthrough
CT: control target
= control target key end

     0   :  { %vm41_vm0 = vcmask 1041408   ;;  %v420_v0 = vmov 0.0   ;;  %vm421_vm1 = vmmov 0   ;;  %vm37_vm2 = vcmask 31744   ;;  %s551_s1 = inlined_call_operand.vmem [shape: bf16[4,128], index: 1, kind: input, shape index: {}]   ;;  %s552_s0 = inlined_call_operand.vmem [shape: f32[8,4], index: 0, kind: input, shape index: {}]   ;;  %s553_s3 = inlined_call_operand.vmem [shape: bf16[128,128], index: 3, kind: input, shape index: {}]   ;;  %s554_s5 = inlined_call_operand.vmem [shape: bf16[128,128], index: 5, kind: input, shape index: {}]   ;;  %s555_s2 = inlined_call_operand.vmem [shape: f32[1,128], index: 2, kind: input, shape index: {}]   ;;  %s556_s4 = inlined_call_operand.vmem [shape: f32[1,128], index: 4, kind: input, shape index: {}]   ;;  %s557_s6 = inlined_call_operand.vmem [shape: f32[1,128], index: 6, kind: input, shape index: {}]   ;;  %s558_s7 = inlined_call_operand.vmem [shape: f32[8,128], index: 7, kind: output, shape index: {}]  }
   0x1   :  { %356 = vmatprep.subr.bf16.mxu0 %v420_v0  ;;  %v29_v1 = vld [vmem:[%s551_s1] sm:$0x3]  ;;  %358 = vmatprep.mubr.msk.bf16.mxu0 %vm421_vm1, %v420_v0  ;;  %v405_v6 = vld [vmem:[%s553_s3 + $0x8] sm:$0xff]   ;;  %v406_v7 = vld [vmem:[%s553_s3 + $0x10] sm:$0xff]  }
   0x2   :  { %v27_v2 = vld [vmem:[%s552_s0] sm:$0xff]  ;;  %v43_v3 = vsel %vm41_vm0, %v29_v1, 0  ;;  %362 = vmatprep.subr.bf16.mxu1 %v420_v0  ;;  %378 = vmatprep.mubr.msk.bf16.mxu1 %vm421_vm1, %v420_v0  ;;  %v407_v8 = vld [vmem:[%s553_s3 + $0x18] sm:$0xff]   ;;  %v409_v10 = vld [vmem:[%s553_s3 + $0x28] sm:$0xff]  }
   0x3   :  { %v28_v4 = vpack.c.bf16 %v27_v2, %v27_v2  ;;  %v404_v5 = vld [vmem:[%s553_s3] sm:$0xff]   ;;  %357 = vmatpush3.bf16.msra.mxu0 %v43_v3  ;;  %v410_v11 = vld [vmem:[%s553_s3 + $0x30] sm:$0xff]   ;;  %v411_v12 = vld [vmem:[%s553_s3 + $0x38] sm:$0xff]  }
   0x4   :  { %363 = vmatpush3.bf16.msra.mxu1 %v404_v5  ;;  %382 = vmatprep.subr.bf16.mxu0 %v420_v0  ;;  %v408_v9 = vld [vmem:[%s553_s3 + $0x20] sm:$0xff]   ;;  %v413_v14 = vld [vmem:[%s554_s5 + $0x8] sm:$0xff]   ;;  %v414_v15 = vld [vmem:[%s554_s5 + $0x10] sm:$0xff]  }
   0x5   :  { %364 = vmatprep.subr.bf16.mxu1 %v420_v0  ;;  %v412_v13 = vld [vmem:[%s554_s5] sm:$0xff]   ;;  %v415_v16 = vld [vmem:[%s554_s5 + $0x18] sm:$0xff]   ;;  %v417_v18 = vld [vmem:[%s554_s5 + $0x28] sm:$0xff]  }
   0x6   :  { %359 = vmatmul.mubr.msk.bf16.vlgmr.msra.gmra.mrb[0].mxu0 %vm37_vm2, %v28_v4  ;;  %v416_v17 = vld [vmem:[%s554_s5 + $0x20] sm:$0xff]   ;;  %v418_v27 = vld [vmem:[%s554_s5 + $0x30] sm:$0xff]   ;;  %v419_v28 = vld [vmem:[%s554_s5 + $0x38] sm:$0xff]  }
   0x7   :  { %398 = vmatprep.mubr.msk.bf16.mxu0 %vm421_vm1, %v420_v0  ;;  %383 = vmatpush3.bf16.msra.mxu0 %v412_v13  ;;  %v316_v19 = vld [vmem:[%s555_s2] ss:$0 sm:$0xff] }
   0x8   :  { %365 = vmatpush3.bf16.msra.mxu1 %v405_v6  ;;  %384 = vmatprep.subr.bf16.mxu0 %v420_v0  ;;  %v318_v29 = vld [vmem:[%s556_s4] ss:$0 sm:$0xff] }
   0x9   :  { %366 = vmatprep.subr.bf16.mxu1 %v420_v0  ;;  %v327_v37 = vld [vmem:[%s557_s6] ss:$0 sm:$0xff] }
   0xb   :  { %385 = vmatpush3.bf16.msra.mxu0 %v413_v14 }
   0xc   :  { %367 = vmatpush3.bf16.msra.mxu1 %v406_v7  ;;  %386 = vmatprep.subr.bf16.mxu0 %v420_v0 }
   0xd   :  { %368 = vmatprep.subr.bf16.mxu1 %v420_v0 }
   0xf   :  { %387 = vmatpush3.bf16.msra.mxu0 %v414_v15 }
  0x10   :  { %369 = vmatpush3.bf16.msra.mxu1 %v407_v8  ;;  %388 = vmatprep.subr.bf16.mxu0 %v420_v0 }
  0x11   :  { %370 = vmatprep.subr.bf16.mxu1 %v420_v0 }
  0x13   :  { %389 = vmatpush3.bf16.msra.mxu0 %v415_v16 }
  0x14   :  { %371 = vmatpush3.bf16.msra.mxu1 %v408_v9  ;;  %390 = vmatprep.subr.bf16.mxu0 %v420_v0 }
  0x15   :  { %372 = vmatprep.subr.bf16.mxu1 %v420_v0 }
  0x17   :  { %391 = vmatpush3.bf16.msra.mxu0 %v416_v17 }
  0x18   :  { %373 = vmatpush3.bf16.msra.mxu1 %v409_v10  ;;  %392 = vmatprep.subr.bf16.mxu0 %v420_v0 }
  0x19   :  { %374 = vmatprep.subr.bf16.mxu1 %v420_v0 }
  0x1b   :  { %393 = vmatpush3.bf16.msra.mxu0 %v417_v18 }
  0x1c   :  { %375 = vmatpush3.bf16.msra.mxu1 %v410_v11  ;;  %394 = vmatprep.subr.bf16.mxu0 %v420_v0 }
  0x1d   :  { %376 = vmatprep.subr.bf16.mxu1 %v420_v0 }
  0x1f   :  { %395 = vmatpush3.bf16.msra.mxu0 %v418_v27 }
  0x20   :  { %377 = vmatpush3.bf16.msra.mxu1 %v411_v12  ;;  %396 = vmatprep.subr.bf16.mxu0 %v420_v0 }
  0x23   :  { %397 = vmatpush3.bf16.msra.mxu0 %v419_v28 }
  0xd9   :  { %v79_v20 = vpop.f32.mrb[0].mxu0 }
  0xda   :  { %v80_v21 = vadd.f32 %v316_v19, %v79_v20  ;;  %v360_v22 = vpop.f32.mrb[1].mxu0 }
  0xdb   :  { %v82_v23 = vpop.f32.mrb[2].mxu0 }
  0xdc   :  { %v85_v24 = vmax.f32 %v80_v21, 0.0  ;;  %v361_v25 = vpop.f32.mrb[3].mxu0 }
  0xde   :  { %v86_v26 = vpack.c.bf16 %v85_v24, %v85_v24 }
  0xe0   :  { %379 = vmatmul.mubr.bf16.vlgmr.msra.gmra.mrb[0].mxu1 %v86_v26 }
 0x1b3   :  { %v192_v30 = vpop.f32.mrb[0].mxu1 }
 0x1b4   :  { %v193_v31 = vadd.f32 %v318_v29, %v192_v30  ;;  %v380_v32 = vpop.f32.mrb[1].mxu1 }
 0x1b5   :  { %v195_v33 = vpop.f32.mrb[2].mxu1 }
 0x1b6   :  { %v198_v34 = vmax.f32 %v193_v31, 0.0  ;;  %v381_v35 = vpop.f32.mrb[3].mxu1 }
 0x1b8   :  { %v199_v36 = vpack.c.bf16 %v198_v34, %v198_v34 }
 0x1ba   :  { %399 = vmatmul.mubr.bf16.vlgmr.msra.gmra.mrb[4].mxu0 %v199_v36 }
 0x28d   :  { %v305_v38 = vpop.f32.mrb[4].mxu0 }
 0x28e   :  { %v306_v39 = vadd.f32 %v327_v37, %v305_v38  ;;  %v400_v40 = vpop.f32.mrb[5].mxu0 }
 0x28f   :  { %v308_v41 = vpop.f32.mrb[6].mxu0 }
 0x290   :  { %311 = vst [vmem:[%s558_s7] sm:$0xff] %v306_v39  ;;  %v401_v42 = vpop.f32.mrb[7].mxu0 }

</bundles_post_ra>
